<compile_context>
chip_gen: v7x
topology: tpu7x:2x2x1
jax: 0.10.0
libtpu: 0.0.40
codegen_flags: <defaults>
</compile_context>

<pallas_src>
import functools
import math

import jax
import jax.numpy as jnp
from jax.experimental import pallas as pl
from jax.experimental.pallas import tpu as pltpu


def _round_up(n, m):
    return (n + m - 1) // m * m


# ---------------------------------------------------------------------------
# Kernel 1: fused projection  [Q*scale | K | V | x@Wg1+bg]  (one MXU pass).
# ---------------------------------------------------------------------------
def _proj_kernel(x_ref, w_ref, b_ref, q_ref, kv_ref, g1_ref):
    dp = q_ref.shape[-1]
    x = x_ref[...]                                   # (T, Dp) bf16
    y = jnp.dot(x, w_ref[...], preferred_element_type=jnp.float32) + b_ref[...]
    q_ref[...] = y[:, :dp].astype(jnp.bfloat16)          # pre-scaled Q
    kv_ref[...] = y[:, dp:3 * dp].astype(jnp.bfloat16)   # packed K | V
    g1_ref[...] = y[:, 3 * dp:]                           # x @ Wg1 + bg (f32)


def _project(xp, wqkvg, bqkvg, T, Dp):
    Sp = xp.shape[0]
    return pl.pallas_call(
        _proj_kernel,
        out_shape=(
            jax.ShapeDtypeStruct((Sp, Dp), jnp.bfloat16),       # Q (scaled)
            jax.ShapeDtypeStruct((Sp, 2 * Dp), jnp.bfloat16),   # K | V
            jax.ShapeDtypeStruct((Sp, Dp), jnp.float32),        # gate linear
        ),
        grid_spec=pltpu.PrefetchScalarGridSpec(
            num_scalar_prefetch=0,
            grid=(Sp // T,),
            in_specs=[
                pl.BlockSpec((T, Dp), lambda i: (i, 0)),
                pl.BlockSpec(wqkvg.shape, lambda i: (0, 0)),
                pl.BlockSpec(bqkvg.shape, lambda i: (0, 0)),
            ],
            out_specs=[
                pl.BlockSpec((T, Dp), lambda i: (i, 0)),
                pl.BlockSpec((T, 2 * Dp), lambda i: (i, 0)),
                pl.BlockSpec((T, Dp), lambda i: (i, 0)),
            ],
        ),
        compiler_params=pltpu.CompilerParams(
            dimension_semantics=("parallel",),
        ),
    )(xp, wqkvg, bqkvg)


# ---------------------------------------------------------------------------
# Kernel 2: flash attention over (query tiles x KV tiles) with online softmax.
# ---------------------------------------------------------------------------
def _attn_kernel(need_mask,
                 q_ref, kv_ref, g1_ref, bias_ref, wg2_ref,
                 o_ref,
                 m_scr, l_scr, acc_scr):
    ki = pl.program_id(1)
    n_kv = pl.num_programs(1)
    dp = o_ref.shape[-1]

    # ---- first KV step of each query tile: reset the accumulators.
    @pl.when(ki == 0)
    def _init():
        m_scr[...] = jnp.full_like(m_scr, -1e30)
        l_scr[...] = jnp.zeros_like(l_scr)
        acc_scr[...] = jnp.zeros_like(acc_scr)

    k = kv_ref[:, :dp]                                # (Tkv, Dp) bf16
    v = kv_ref[:, dp:]                                # (Tkv, Dp) bf16

    # ---- scores: Q already carries the 1/sqrt(D) scale; contract last dims.
    s = jax.lax.dot_general(q_ref[...], k, (((1,), (1,)), ((), ())),
                            preferred_element_type=jnp.float32)
    if need_mask:  # static trace-time decision; (1, Tkv) additive 0/-1e30 bias
        s = s + bias_ref[...]

    # ---- online softmax update (all statistics in f32).
    m_prev = m_scr[...]
    m_new = jnp.maximum(m_prev, jnp.max(s, axis=-1, keepdims=True))
    alpha = jnp.exp(m_prev - m_new)
    p = jnp.exp(s - m_new)
    l_scr[...] = alpha * l_scr[...] + jnp.sum(p, axis=-1, keepdims=True)
    acc_scr[...] = alpha * acc_scr[...] + jnp.dot(
        p.astype(jnp.bfloat16), v, preferred_element_type=jnp.float32)
    m_scr[...] = m_new

    # ---- last KV step: normalize, apply the gate, write the output tile.
    @pl.when(ki == n_kv - 1)
    def _finalize():
        attn_out = acc_scr[...] * pl.reciprocal(l_scr[...], approx=True)
        gate_lin = g1_ref[...] + jnp.dot(attn_out.astype(jnp.bfloat16),
                                         wg2_ref[...],
                                         preferred_element_type=jnp.float32)
        o_ref[...] = (jax.nn.sigmoid(gate_lin) * attn_out).astype(o_ref.dtype)


def _attn_vmem_bytes(T, Dp):
    """Rough working-set estimate used to size vmem_limit_bytes."""
    bufs = 2 * (T * Dp * 2        # Q bf16
                + T * 2 * Dp * 2  # K|V bf16
                + T * Dp * 4      # gate linear f32
                + T * 4           # column bias
                + Dp * Dp * 2     # Wg2 bf16
                + T * Dp * 4)     # output f32
    scratch = T * Dp * 4 + 2 * T * 4
    temps = 8 * T * T * 4         # (T,T) f32 score/prob temporaries + margin
    return bufs + scratch + temps


def flash_attention(x, params, *, block_seq=512):
    """x: [S, D] float32.  params: dict of pre-transposed weights/biases."""
    S, D = x.shape
    f32, bf16 = jnp.float32, jnp.bfloat16

    # Lane-dense padded embed dim; sequence padded to the tile size.
    Dp = _round_up(max(D, 128), 128)
    T = min(block_seq, _round_up(S, 8))
    Sp = _round_up(S, T)

    def pad2(a, r, c):
        return jnp.pad(a, ((0, r - a.shape[0]), (0, c - a.shape[1])))

    scale = 1.0 / math.sqrt(D)          # matches torch: sqrt(x.size(-1))

    # Input: padded AND cast to bf16 host-side (halves projection DMA bytes).
    xp = pad2(x, Sp, Dp).astype(bf16)

    # Fused projection weight [Wq*scale | Wk | Wv | Wg1] and bias
    # [bq*scale | bk | bv | bg]; Wg2 stays separate for the finalize step.
    wqkvg = jnp.concatenate([
        pad2(params["wq"] * scale, Dp, Dp),
        pad2(params["wk"], Dp, Dp),
        pad2(params["wv"], Dp, Dp),
        pad2(params["wg1"], Dp, Dp),
    ], axis=1).astype(bf16)
    bqkvg = jnp.concatenate([
        pad2(params["bq"] * scale, 1, Dp),
        pad2(params["bk"], 1, Dp),
        pad2(params["bv"], 1, Dp),
        pad2(params["bg"], 1, Dp),
    ], axis=1).astype(f32)
    wg2 = pad2(params["wg2"], Dp, Dp).astype(bf16)

    # Stage 1: project Q (pre-scaled), K|V, gate-linear once.
    q, kv, g1 = _project(xp, wqkvg, bqkvg, T, Dp)

    # Additive column bias masking padded KV columns (0 valid / -1e30 padded).
    need_mask = Sp != S
    colbias = jnp.where(jnp.arange(Sp) < S, 0.0, -1e30).astype(f32).reshape(1, Sp)

    grid = (Sp // T, Sp // T)
    kernel = functools.partial(_attn_kernel, need_mask)
    vmem_limit = int(min(60 * 2**20, max(32 * 2**20, _attn_vmem_bytes(T, Dp))))

    out = pl.pallas_call(
        kernel,
        out_shape=jax.ShapeDtypeStruct((Sp, Dp), x.dtype),
        grid_spec=pltpu.PrefetchScalarGridSpec(
            num_scalar_prefetch=0,
            grid=grid,
            in_specs=[
                pl.BlockSpec((T, Dp), lambda qi, ki: (qi, 0)),      # Q tile
                pl.BlockSpec((T, 2 * Dp), lambda qi, ki: (ki, 0)),  # K|V tile
                pl.BlockSpec((T, Dp), lambda qi, ki: (qi, 0)),      # gate lin
                pl.BlockSpec((1, T), lambda qi, ki: (0, ki)),       # col bias
                pl.BlockSpec((Dp, Dp), lambda qi, ki: (0, 0)),      # Wg2
            ],
            out_specs=pl.BlockSpec((T, Dp), lambda qi, ki: (qi, 0)),
            scratch_shapes=[
                pltpu.VMEM((T, 1), f32),     # running max m
                pltpu.VMEM((T, 1), f32),     # running denominator l
                pltpu.VMEM((T, Dp), f32),    # f32 output accumulator
            ],
        ),
        compiler_params=pltpu.CompilerParams(
            dimension_semantics=("parallel", "arbitrary"),
            vmem_limit_bytes=vmem_limit,
        ),
    )(q, kv, g1, colbias, wg2)

    return out[:S, :D]


def init_params(key, embed_dim):
    """Deterministic synthetic parameters (shapes match the nn.Linear layers)."""
    D = embed_dim
    ks = jax.random.split(key, 8)
    scale = 1.0 / jnp.sqrt(jnp.float32(D))
    # nn.Linear(D, D).weight is [D, D]; we store W.T -> [D_in, D_out]
    wq = jax.random.uniform(ks[0], (D, D), jnp.float32, -scale, scale)
    wk = jax.random.uniform(ks[1], (D, D), jnp.float32, -scale, scale)
    wv = jax.random.uniform(ks[2], (D, D), jnp.float32, -scale, scale)
    bq = jax.random.uniform(ks[3], (1, D), jnp.float32, -scale, scale)
    bk = jax.random.uniform(ks[4], (1, D), jnp.float32, -scale, scale)
    bv = jax.random.uniform(ks[5], (1, D), jnp.float32, -scale, scale)
    # nn.Linear(2D, D).weight is [D, 2D]; W.T is [2D, D], split into two [D, D]
    gscale = 1.0 / jnp.sqrt(jnp.float32(2 * D))
    wg_t = jax.random.uniform(ks[6], (2 * D, D), jnp.float32, -gscale, gscale)
    bg = jax.random.uniform(ks[7], (1, D), jnp.float32, -gscale, gscale)
    return {
        "wq": wq, "bq": bq,
        "wk": wk, "bk": bk,
        "wv": wv, "bv": bv,
        "wg1": wg_t[:D, :], "wg2": wg_t[D:, :], "bg": bg,
    }


def flash_attention_ref(x, p):
    """Pure-JAX f32 reference mirroring the PyTorch forward (operation=None)."""
    q = x @ p["wq"] + p["bq"]
    k = x @ p["wk"] + p["bk"]
    v = x @ p["wv"] + p["bv"]
    s = (q @ k.T) / jnp.sqrt(jnp.float32(x.shape[-1]))
    attn = jax.nn.softmax(s, axis=-1)
    attn_out = attn @ v
    gate = jax.nn.sigmoid(x @ p["wg1"] + attn_out @ p["wg2"] + p["bg"])
    return gate * attn_out


if __name__ == "__main__":
    key = jax.random.PRNGKey(0)
    k_param, k_x1, k_x2 = jax.random.split(key, 3)

    # Small shape consistent with the module.
    seq, embed_dim = 8, 32
    params = init_params(k_param, embed_dim)
    x = jax.random.normal(k_x1, (seq, embed_dim), jnp.float32)

    out = jax.block_until_ready(flash_attention(x, params))
    ref = flash_attention_ref(x, params)
    assert out.shape == (seq, embed_dim)
    # bf16 MXU inputs with f32 accumulation -> compare with a loose tolerance.
    assert jnp.allclose(out, ref, atol=2e-2, rtol=2e-2), \
        float(jnp.max(jnp.abs(out - ref)))

    # Second shape exercises the multi-tile grid, online softmax and masking.
    seq2 = 384
    x2 = jax.random.normal(k_x2, (seq2, embed_dim), jnp.float32)
    out2 = jax.block_until_ready(flash_attention(x2, params, block_seq=256))
    ref2 = flash_attention_ref(x2, params)
    assert out2.shape == (seq2, embed_dim)
    assert jnp.allclose(out2, ref2, atol=2e-2, rtol=2e-2), \
        float(jnp.max(jnp.abs(out2 - ref2)))

    print("KERNEL_OK")
</pallas_src>

<mosaic_0001>
module attributes {stable_mosaic.version = 11 : i64} {
  func.func @_proj_kernel(%arg0: i32, %arg1: memref<8x128xbf16, #tpu.memory_space<vmem>>, %arg2: memref<128x512xbf16, #tpu.memory_space<vmem>>, %arg3: memref<1x512xf32, #tpu.memory_space<vmem>>, %arg4: memref<8x128xbf16, #tpu.memory_space<vmem>>, %arg5: memref<8x256xbf16, #tpu.memory_space<vmem>>, %arg6: memref<8x128xf32, #tpu.memory_space<vmem>>) attributes {dimension_semantics = [#tpu.dimension_semantics<parallel>], iteration_bounds = array<i64: 1>, scalar_prefetch = 0 : i64, scratch_operands = 0 : i64, tpu.core_type = #tpu.core_type<tc>, window_params = [{transform_indices = @transform_0, window_bounds = array<i64: 8, 128>}, {pipeline_mode = #tpu.pipeline_mode<synchronous>, transform_indices = @transform_1, window_bounds = array<i64: 128, 512>}, {pipeline_mode = #tpu.pipeline_mode<synchronous>, transform_indices = @transform_2, window_bounds = array<i64: 1, 512>}, {transform_indices = @transform_3, window_bounds = array<i64: 8, 128>}, {transform_indices = @transform_4, window_bounds = array<i64: 8, 256>}, {transform_indices = @transform_5, window_bounds = array<i64: 8, 128>}]} {
    %c0 = arith.constant 0 : index
    %c0_0 = arith.constant 0 : index
    %0 = vector.load %arg1[%c0, %c0_0] : memref<8x128xbf16, #tpu.memory_space<vmem>>, vector<8x128xbf16>
    %c0_1 = arith.constant 0 : index
    %c0_2 = arith.constant 0 : index
    %1 = vector.load %arg2[%c0_1, %c0_2] : memref<128x512xbf16, #tpu.memory_space<vmem>>, vector<128x512xbf16>
    %cst = arith.constant dense<0.000000e+00> : vector<8x512xf32>
    %2 = tpu.matmul %0, %1, %cst {dimension_numbers = #tpu.dot_dimension_numbers<[1], [0], [0], [1], [0, 0, 1, 1], [], []>} : vector<8x128xbf16>, vector<128x512xbf16>, vector<8x512xf32> -> vector<8x512xf32>
    %c0_3 = arith.constant 0 : index
    %c0_4 = arith.constant 0 : index
    %3 = vector.load %arg3[%c0_3, %c0_4] : memref<1x512xf32, #tpu.memory_space<vmem>>, vector<1x512xf32>
    %4 = vector.broadcast %3 : vector<1x512xf32> to vector<8x512xf32>
    %5 = arith.addf %2, %4 : vector<8x512xf32>
    %6 = vector.extract_strided_slice %5 {offsets = [0, 0], sizes = [8, 128], strides = [1, 1]} : vector<8x512xf32> to vector<8x128xf32>
    %7 = arith.truncf %6 : vector<8x128xf32> to vector<8x128xbf16>
    %c0_5 = arith.constant 0 : index
    %c0_6 = arith.constant 0 : index
    %8 = vector.load %arg4[%c0_5, %c0_6] : memref<8x128xbf16, #tpu.memory_space<vmem>>, vector<8x128xbf16>
    tpu.vector_store %arg4[%c0_5, %c0_6], %7 {strides = array<i32>} : memref<8x128xbf16, #tpu.memory_space<vmem>>, vector<8x128xbf16>,
    %9 = vector.extract_strided_slice %5 {offsets = [0, 128], sizes = [8, 256], strides = [1, 1]} : vector<8x512xf32> to vector<8x256xf32>
    %10 = arith.truncf %9 : vector<8x256xf32> to vector<8x256xbf16>
    %c0_7 = arith.constant 0 : index
    %c0_8 = arith.constant 0 : index
    %11 = vector.load %arg5[%c0_7, %c0_8] : memref<8x256xbf16, #tpu.memory_space<vmem>>, vector<8x256xbf16>
    tpu.vector_store %arg5[%c0_7, %c0_8], %10 {strides = array<i32>} : memref<8x256xbf16, #tpu.memory_space<vmem>>, vector<8x256xbf16>,
    %12 = vector.extract_strided_slice %5 {offsets = [0, 384], sizes = [8, 128], strides = [1, 1]} : vector<8x512xf32> to vector<8x128xf32>
    %c0_9 = arith.constant 0 : index
    %c0_10 = arith.constant 0 : index
    %13 = vector.load %arg6[%c0_9, %c0_10] : memref<8x128xf32, #tpu.memory_space<vmem>>, vector<8x128xf32>
    tpu.vector_store %arg6[%c0_9, %c0_10], %12 {strides = array<i32>} : memref<8x128xf32, #tpu.memory_space<vmem>>, vector<8x128xf32>,
    return
  }
  func.func @transform_0(%arg0: i32) -> (i32, i32) {
    %c0_i32 = arith.constant 0 : i32
    %c0_i32_0 = arith.constant 0 : i32
    return %arg0, %c0_i32 : i32, i32
  }
  func.func @transform_1(%arg0: i32) -> (i32, i32) {
    %c0_i32 = arith.constant 0 : i32
    %c0_i32_0 = arith.constant 0 : i32
    %c0_i32_1 = arith.constant 0 : i32
    return %c0_i32, %c0_i32_0 : i32, i32
  }
  func.func @transform_2(%arg0: i32) -> (i32, i32) {
    %c0_i32 = arith.constant 0 : i32
    %c0_i32_0 = arith.constant 0 : i32
    %c0_i32_1 = arith.constant 0 : i32
    return %c0_i32, %c0_i32_0 : i32, i32
  }
  func.func @transform_3(%arg0: i32) -> (i32, i32) {
    %c0_i32 = arith.constant 0 : i32
    %c0_i32_0 = arith.constant 0 : i32
    return %arg0, %c0_i32 : i32, i32
  }
  func.func @transform_4(%arg0: i32) -> (i32, i32) {
    %c0_i32 = arith.constant 0 : i32
    %c0_i32_0 = arith.constant 0 : i32
    return %arg0, %c0_i32 : i32, i32
  }
  func.func @transform_5(%arg0: i32) -> (i32, i32) {
    %c0_i32 = arith.constant 0 : i32
    %c0_i32_0 = arith.constant 0 : i32
    return %arg0, %c0_i32 : i32, i32
  }
}

</mosaic_0001>

<bundles_post_ra>
// kernel: tpu_custom_call.1
= control target key start
LH: loop header
LB: loop body
LE: loop exit
PB: predicated region body
PF: predicated region fallthrough
CT: control target
= control target key end

     0   :  { %11 = vsyncpa [#allocation3], 0  ;;  %s728_s0 = inlined_call_operand.hbm [shape: bf16[8,128], index: 0, kind: input, shape index: {}]   ;;  %s729_s1 = inlined_call_operand.hbm [shape: bf16[128,512], index: 1, kind: input, shape index: {}]   ;;  %s730_s2 = inlined_call_operand.vmem [shape: f32[1,512], index: 2, kind: input, shape index: {}]   ;;  %s731_s3 = inlined_call_operand.hbm [shape: bf16[8,128], index: 3, kind: output, shape index: {0}]   ;;  %s732_s4 = inlined_call_operand.hbm [shape: bf16[8,256], index: 4, kind: output, shape index: {1}]   ;;  %s733_s5 = inlined_call_operand.hbm [shape: f32[8,128], index: 5, kind: output, shape index: {2}]  }
   0x1   :  { %12 = vsyncpa [#allocation6], 0 }
   0x2   :  { %13 = vsyncpa [#allocation4], 0 }
   0x3   :  { %14 = vsyncpa [#allocation9], 0  ;;  %s606_s18 = smov [#allocation2]   ;;  %s607_s20 = smov [#allocation5]  }
   0x4   :  { %s21_s19 = sshll.u32 %s606_s18, 4  ;;  %s30_s21 = sshll.u32 %s607_s20, 4  ;;  %s22_s19 = int_to_ptr.vmem [resolvable:$true] %s21_s19  ;;  %s644_s21 = int_to_ptr.vmem [resolvable:$true] %s30_s21 }
   0x5   :  { %s488_s24 = scalar_lea.hbm %s728_s0, 64 }
   0x6   :  { %p489_p0 = scmp.ne.s32.totalorder %s728_s0, %s488_s24  ;;  %p492_p1 = scmp.lt.u32.totalorder %s488_s24, %s728_s0 }
   0x8   :  { %p494_p2 = pnand %p492_p1, %p489_p0 }
   0xa   :  { %497 = shalt.err (!%p494_p2)
}
   0xb   :  { %s498_s29 = scalar_lea.vmem %s22_s19, 64  ;;  %p503_p4 = scmp.lt.s32.totalorder %s22_s19, %s22_s19 }
   0xc   :  { %p499_p3 = scmp.ne.s32.totalorder %s22_s19, %s498_s29  ;;  %p504_p5 = scmp.lt.s32.totalorder %s498_s29, %s498_s29 }
   0xe   :  { %p505_p6 = por %p504_p5, %p503_p4 }
  0x10   :  { %p506_p7 = pnand %p505_p6, %p499_p3 }
  0x12   :  { %509 = shalt.err (!%p506_p7)
}
  0x13   :  { %24 = dma.hbm_to_vmem [thread:$0]  %s728_s0, 64, %s22_s19, [#allocation3]  }
  0x14   :  { %s510_s9 = scalar_lea.hbm %s729_s1, 4096 }
  0x15   :  { %p511_p8 = scmp.ne.s32.totalorder %s729_s1, %s510_s9  ;;  %p514_p9 = scmp.lt.u32.totalorder %s510_s9, %s729_s1 }
  0x17   :  { %p516_p10 = pnand %p514_p9, %p511_p8 }
  0x19   :  { %519 = shalt.err (!%p516_p10)
}
  0x1a   :  { %s520_s14 = scalar_lea.vmem %s644_s21, 4096  ;;  %p525_p12 = scmp.lt.s32.totalorder %s644_s21, %s644_s21 }
  0x1b   :  { %p521_p11 = scmp.ne.s32.totalorder %s644_s21, %s520_s14  ;;  %p526_p13 = scmp.lt.s32.totalorder %s520_s14, %s520_s14 }
  0x1d   :  { %p527_p0 = por %p526_p13, %p525_p12 }
  0x1f   :  { %p528_p1 = pnand %p527_p0, %p521_p11 }
  0x21   :  { %531 = shalt.err (!%p528_p1)
}
  0x22   :  { %s608_s0 = smov 256   ;;  %s609_s15 = smov 16  }
  0x23   :  { %36 = dma.hbm_to_vmem [thread:$0]  %s729_s1, 4096, %s644_s21, [#allocation6], %s608_s0, %s608_s0, %s609_s15  }
  0x24   :  { %598 = dma.done.wait [#allocation3], 64  }
  0x25   :  { %599 = vsyncadd [#allocation3], 4294967232 }
  0x26   :  { %600 = dma.done.wait [#allocation6], 4096  }
  0x27   :  { %601 = vsyncadd [#allocation6], 4294963200  ;;  %v610_v0 = vmov 0   ;;  %v440_v1 = vld [vmem:[#allocation5 + $0x4] ss:$16 sps:$4 sm:$0xff]   ;;  %v81_v34 = vlaneseq  ;;  %s611_s19 = smov [#allocation7]  }
  0x28   :  { %293 = vmatprep.mubr.bf16.mxu0 %v610_v0  ;;  %334 = vmatprep.mubr.bf16.mxu1 %v610_v0  ;;  %v442_v2 = vld [vmem:[#allocation5 + $0xc] ss:$16 sps:$4 sm:$0xff]   ;;  %v444_v3 = vld [vmem:[#allocation5] ss:$16 sps:$4 sm:$0xff]   ;;  %v445_v4 = vld [vmem:[#allocation5 + $0x8] ss:$16 sps:$4 sm:$0xff]  }
  0x29   :  { %261 = vmatprep.subr.bf16.mxu0 %v440_v1  ;;  %302 = vmatprep.subr.bf16.mxu1 %v442_v2  ;;  %v446_v5 = vld [vmem:[#allocation5 + $0x24] ss:$16 sps:$4 sm:$0xff]   ;;  %v448_v6 = vld [vmem:[#allocation5 + $0x2c] ss:$16 sps:$4 sm:$0xff]   ;;  %v450_v7 = vld [vmem:[#allocation5 + $0x20] ss:$16 sps:$4 sm:$0xff]  }
  0x2a   :  { %262 = vmatpush1.bf16.msra.mxu0 %v444_v3  ;;  %303 = vmatpush1.bf16.msra.mxu1 %v445_v4  ;;  %v451_v8 = vld [vmem:[#allocation5 + $0x28] ss:$16 sps:$4 sm:$0xff]   ;;  %v452_v9 = vld [vmem:[#allocation5 + $0x44] ss:$16 sps:$4 sm:$0xff]   ;;  %v454_v10 = vld [vmem:[#allocation5 + $0x4c] ss:$16 sps:$4 sm:$0xff]  }
  0x2b   :  { %263 = vmatprep.subr.bf16.mxu0 %v446_v5  ;;  %304 = vmatprep.subr.bf16.mxu1 %v448_v6  ;;  %v456_v11 = vld [vmem:[#allocation5 + $0x40] ss:$16 sps:$4 sm:$0xff]   ;;  %v457_v12 = vld [vmem:[#allocation5 + $0x48] ss:$16 sps:$4 sm:$0xff]   ;;  %v458_v13 = vld [vmem:[#allocation5 + $0x64] ss:$16 sps:$4 sm:$0xff]  }
  0x2c   :  { %v460_v14 = vld [vmem:[#allocation5 + $0x6c] ss:$16 sps:$4 sm:$0xff]   ;;  %v462_v15 = vld [vmem:[#allocation5 + $0x60] ss:$16 sps:$4 sm:$0xff]   ;;  %v463_v16 = vld [vmem:[#allocation5 + $0x68] ss:$16 sps:$4 sm:$0xff]  }
  0x2d   :  { %v464_v17 = vld [vmem:[#allocation5 + $0x84] ss:$16 sps:$4 sm:$0xff]   ;;  %v466_v18 = vld [vmem:[#allocation5 + $0x8c] ss:$16 sps:$4 sm:$0xff]   ;;  %v468_v19 = vld [vmem:[#allocation5 + $0x80] ss:$16 sps:$4 sm:$0xff]  }
  0x2e   :  { %264 = vmatpush1.bf16.msra.mxu0 %v450_v7  ;;  %305 = vmatpush1.bf16.msra.mxu1 %v451_v8  ;;  %v469_v20 = vld [vmem:[#allocation5 + $0x88] ss:$16 sps:$4 sm:$0xff]   ;;  %v470_v21 = vld [vmem:[#allocation5 + $0xa4] ss:$16 sps:$4 sm:$0xff]   ;;  %v472_v22 = vld [vmem:[#allocation5 + $0xac] ss:$16 sps:$4 sm:$0xff]  }
  0x2f   :  { %265 = vmatprep.subr.bf16.mxu0 %v452_v9  ;;  %306 = vmatprep.subr.bf16.mxu1 %v454_v10  ;;  %v474_v23 = vld [vmem:[#allocation5 + $0xa0] ss:$16 sps:$4 sm:$0xff]   ;;  %v475_v24 = vld [vmem:[#allocation5 + $0xa8] ss:$16 sps:$4 sm:$0xff]   ;;  %v476_v25 = vld [vmem:[#allocation5 + $0xc4] ss:$16 sps:$4 sm:$0xff]  }
  0x30   :  { %v478_v26 = vld [vmem:[#allocation5 + $0xcc] ss:$16 sps:$4 sm:$0xff]   ;;  %v480_v27 = vld [vmem:[#allocation5 + $0xc0] ss:$16 sps:$4 sm:$0xff]   ;;  %v481_v28 = vld [vmem:[#allocation5 + $0xc8] ss:$16 sps:$4 sm:$0xff]  }
  0x31   :  { %v482_v29 = vld [vmem:[#allocation5 + $0xe4] ss:$16 sps:$4 sm:$0xff]   ;;  %v484_v30 = vld [vmem:[#allocation5 + $0xec] ss:$16 sps:$4 sm:$0xff]   ;;  %v486_v31 = vld [vmem:[#allocation5 + $0xe0] ss:$16 sps:$4 sm:$0xff]  }
  0x32   :  { %266 = vmatpush1.bf16.msra.mxu0 %v456_v11  ;;  %307 = vmatpush1.bf16.msra.mxu1 %v457_v12  ;;  %v487_v32 = vld [vmem:[#allocation5 + $0xe8] ss:$16 sps:$4 sm:$0xff]   ;;  %v46_v33 = vld [vmem:[#allocation2] sm:$0xf]  ;;  %v82_v35 = vshrl.u32 %v81_v34, 7  ;;  %s361_s20 = sshll.u32 %s611_s19, 4  ;;  %s362_s20 = int_to_ptr.vmem [resolvable:$true] %s361_s20 }
  0x33   :  { %267 = vmatprep.subr.bf16.mxu0 %v458_v13  ;;  %308 = vmatprep.subr.bf16.mxu1 %v460_v14  ;;  %v79_v38 = vld [vmem:[%s730_s2] sm:$0xf]  ;;  %s612_s21 = smov [#allocation8]   ;;  %s613_s2 = smov [#allocation10]  }
  0x34   :  { %v83_v36 = vsub.s32 0, %v82_v35  ;;  %v91_v37 = vsub.s32 2, %v82_v35  ;;  %v87_v39 = vsub.s32 1, %v82_v35  ;;  %v95_v40 = vsub.s32 3, %v82_v35  ;;  %s371_s22 = sshll.u32 %s612_s21, 4  ;;  %s381_s23 = sshll.u32 %s613_s2, 4  ;;  %s678_s22 = int_to_ptr.vmem [resolvable:$true] %s371_s22  ;;  %s680_s23 = int_to_ptr.vmem [resolvable:$true] %s381_s23 }
  0x35   :  { %s532_s24 = scalar_lea.vmem %s362_s20, 64  ;;  %p537_p3 = scmp.lt.s32.totalorder %s362_s20, %s362_s20 }
  0x36   :  { %268 = vmatpush1.bf16.msra.mxu0 %v462_v15  ;;  %309 = vmatpush1.bf16.msra.mxu1 %v463_v16  ;;  %v84_v41 = vrot.slane %v79_v38, %v83_v36  ;;  %v92_v42 = vrot.slane %v79_v38, %v91_v37  ;;  %v88_v43 = vrot.slane %v79_v38, %v87_v39  ;;  %p533_p2 = scmp.ne.s32.totalorder %s362_s20, %s532_s24  ;;  %p538_p4 = scmp.lt.s32.totalorder %s532_s24, %s532_s24 }
  0x37   :  { %269 = vmatprep.subr.bf16.mxu0 %v464_v17  ;;  %310 = vmatprep.subr.bf16.mxu1 %v466_v18  ;;  %v96_v44 = vrot.slane %v79_v38, %v95_v40 }
  0x38   :  { %p539_p5 = por %p538_p4, %p537_p3 }
  0x3a   :  { %270 = vmatpush1.bf16.msra.mxu0 %v468_v19  ;;  %311 = vmatpush1.bf16.msra.mxu1 %v469_v20  ;;  %p540_p6 = pnand %p539_p5, %p533_p2 }
  0x3b   :  { %271 = vmatprep.subr.bf16.mxu0 %v470_v21  ;;  %312 = vmatprep.subr.bf16.mxu1 %v472_v22 }
  0x3e   :  { %272 = vmatpush1.bf16.msra.mxu0 %v474_v23  ;;  %313 = vmatpush1.bf16.msra.mxu1 %v475_v24 }
  0x3f   :  { %273 = vmatprep.subr.bf16.mxu0 %v476_v25  ;;  %314 = vmatprep.subr.bf16.mxu1 %v478_v26 }
  0x42   :  { %274 = vmatpush1.bf16.msra.mxu0 %v480_v27  ;;  %315 = vmatpush1.bf16.msra.mxu1 %v481_v28 }
  0x43   :  { %275 = vmatprep.subr.bf16.mxu0 %v482_v29  ;;  %316 = vmatprep.subr.bf16.mxu1 %v484_v30 }
  0x46   :  { %276 = vmatpush1.bf16.msra.mxu0 %v486_v31  ;;  %317 = vmatpush1.bf16.msra.mxu1 %v487_v32 }
  0x49   :  { %294 = vmatmul.mubr.bf16.vlgmr.msra.gmra.mrb[0].mxu0 %v46_v33  ;;  %335 = vmatmul.mubr.bf16.vlgmr.msra.gmra.mrb[0].mxu1 %v46_v33 }
 0x11c   :  { %v295_v45 = vpop.f32.mrb[0].mxu0  ;;  %v336_v46 = vpop.f32.mrb[0].mxu1 }
 0x11d   :  { %v296_v47 = vadd.f32 %v295_v45, %v84_v41  ;;  %v337_v48 = vadd.f32 %v336_v46, %v92_v42  ;;  %v297_v49 = vpop.f32.mrb[1].mxu0  ;;  %v338_v50 = vpop.f32.mrb[1].mxu1 }
 0x11e   :  { %v298_v51 = vadd.f32 %v297_v49, %v88_v43  ;;  %v339_v52 = vadd.f32 %v338_v50, %v96_v44  ;;  %v299_v53 = vpop.f32.mrb[2].mxu0  ;;  %v340_v54 = vpop.f32.mrb[2].mxu1 }
 0x11f   :  { %v343_v55 = vpack.c.bf16 %v296_v47, %v296_v47  ;;  %v300_v56 = vpop.f32.mrb[3].mxu0  ;;  %v341_v57 = vpop.f32.mrb[3].mxu1 }
 0x120   :  { %v431_v58 = vpack.c.bf16 %v337_v48, %v298_v51  ;;  %354 = vst [vmem:[#allocation10] sm:$0xff] %v339_v52 }
 0x121   :  { %344 = vst [vmem:[#allocation7] sm:$0xf] %v343_v55 }
 0x122   :  { %353 = vst [vmem:[#allocation8] sm:$0xff] %v431_v58 }
 0x123   :  { %543 = shalt.err (!%p540_p6)
}
 0x124   :  { %s544_s27 = scalar_lea.hbm %s731_s3, 64 }
 0x125   :  { %p545_p7 = scmp.ne.s32.totalorder %s731_s3, %s544_s27  ;;  %p548_p8 = scmp.lt.u32.totalorder %s544_s27, %s731_s3 }
 0x127   :  { %p550_p9 = pnand %p548_p8, %p545_p7 }
 0x129   :  { %553 = shalt.err (!%p550_p9)
}
 0x12a   :  { %364 = dma.vmem_to_hbm [thread:$0]  %s362_s20, 64, %s731_s3, [#allocation4]  }
 0x12b   :  { %s554_s9 = scalar_lea.vmem %s678_s22, 128  ;;  %p559_p11 = scmp.lt.s32.totalorder %s678_s22, %s678_s22 }
 0x12c   :  { %p555_p10 = scmp.ne.s32.totalorder %s678_s22, %s554_s9  ;;  %p560_p12 = scmp.lt.s32.totalorder %s554_s9, %s554_s9 }
 0x12e   :  { %p561_p13 = por %p560_p12, %p559_p11 }
 0x130   :  { %p562_p0 = pnand %p561_p13, %p555_p10 }
 0x132   :  { %565 = shalt.err (!%p562_p0)
}
 0x133   :  { %s566_s12 = scalar_lea.hbm %s732_s4, 128 }
 0x134   :  { %p567_p1 = scmp.ne.s32.totalorder %s732_s4, %s566_s12  ;;  %p570_p2 = scmp.lt.u32.totalorder %s566_s12, %s732_s4 }
 0x136   :  { %p572_p3 = pnand %p570_p2, %p567_p1 }
 0x138   :  { %575 = shalt.err (!%p572_p3)
}
 0x139   :  { %374 = dma.vmem_to_hbm [thread:$0]  %s678_s22, 128, %s732_s4, [#allocation9]  }
 0x13a   :  { %s576_s17 = scalar_lea.vmem %s680_s23, 128  ;;  %p581_p5 = scmp.lt.s32.totalorder %s680_s23, %s680_s23 }
 0x13b   :  { %p577_p4 = scmp.ne.s32.totalorder %s680_s23, %s576_s17  ;;  %p582_p6 = scmp.lt.s32.totalorder %s576_s17, %s576_s17 }
 0x13d   :  { %p583_p7 = por %p582_p6, %p581_p5 }
 0x13f   :  { %p584_p8 = pnand %p583_p7, %p577_p4 }
 0x141   :  { %587 = shalt.err (!%p584_p8)
}
 0x142   :  { %s588_s19 = scalar_lea.hbm %s733_s5, 128 }
 0x143   :  { %p589_p9 = scmp.ne.s32.totalorder %s733_s5, %s588_s19  ;;  %p592_p10 = scmp.lt.u32.totalorder %s588_s19, %s733_s5 }
 0x145   :  { %p594_p11 = pnand %p592_p10, %p589_p9 }
 0x147   :  { %597 = shalt.err (!%p594_p11)
}
 0x148   :  { %384 = dma.vmem_to_hbm [thread:$0]  %s680_s23, 128, %s733_s5, [#allocation9]  }
 0x149   :  { %602 = dma.done.wait [#allocation4], 64  }
 0x14a   :  { %603 = vsyncadd [#allocation4], 4294967232 }
 0x14b   :  { %604 = dma.done.wait [#allocation9], 256  }
 0x14c   :  { %605 = vsyncadd [#allocation9], 4294967040 }
 0x14d   :  { %394 = vsyncpa [#allocation3], 1 }
 0x14e   :  { %395 = vsyncpa [#allocation6], 1 }
 0x14f   :  { %396 = vsyncpa [#allocation4], 1 }
 0x150   :  { %397 = vsyncpa [#allocation9], 1 }

</bundles_post_ra>
